<compile_context>
chip_gen: v6e
topology: v6e:2x2x1
jax: 0.10.0
libtpu: 0.0.40
codegen_flags: <defaults>
</compile_context>

<pallas_src>
import functools

import jax
import jax.numpy as jnp
from jax.experimental import pallas as pl
from jax.experimental.pallas import tpu as pltpu

_EPS = 1e-6  # matches torch.nn.functional.pairwise_distance default eps


def _vmem_capacity_bytes():
    """Physical VMEM per TensorCore; conservative 64 MiB fallback (v7x)."""
    try:
        info = pltpu.get_tpu_info()
        cap = getattr(info, "vmem_capacity_bytes", None)
        if cap:
            return int(cap)
    except Exception:
        pass
    return 64 << 20


def _triplet_loss_kernel(margin_ref, a_ref, p_ref, n_ref, psum_ref, *,
                         batch, block_rows, needs_mask):
    i = pl.program_id(0)

    a = a_ref[...].astype(jnp.float32)
    p = p_ref[...].astype(jnp.float32)
    n = n_ref[...].astype(jnp.float32)

    # F.pairwise_distance(x, y, p=2, eps=1e-6) == ||x - y + eps||_2 over last dim
    dpos = jnp.sqrt(jnp.sum((a - p + _EPS) ** 2, axis=-1, keepdims=True))  # (TB, 1)
    dneg = jnp.sqrt(jnp.sum((a - n + _EPS) ** 2, axis=-1, keepdims=True))  # (TB, 1)

    margin = margin_ref[0]
    loss = jnp.maximum(dpos - dneg + margin, 0.0)                          # (TB, 1)

    if needs_mask:
        # Only the final (partial) tile contains garbage rows; mask just there.
        last = pl.num_programs(0) - 1

        @pl.when(i == last)
        def _():
            row = (jax.lax.broadcasted_iota(jnp.int32, loss.shape, 0)
                   + i * block_rows)
            masked = jnp.where(row < batch, loss, 0.0)
            psum_ref[...] = jnp.broadcast_to(jnp.sum(masked), psum_ref.shape)

        @pl.when(i != last)
        def _():
            psum_ref[...] = jnp.broadcast_to(jnp.sum(loss), psum_ref.shape)
    else:
        # Full-tile fast path: no iota / compare / select at all.
        psum_ref[...] = jnp.broadcast_to(jnp.sum(loss), psum_ref.shape)


def triplet_loss(anchor, pos, neg, margin=1.0, block_rows=None):
    assert anchor.shape == pos.shape == neg.shape
    assert anchor.ndim == 2
    B, D = anchor.shape
    itemsize = jnp.dtype(anchor.dtype).itemsize
    sublane = 16 if itemsize == 2 else 8  # bf16 packs 16 rows per vreg

    vmem_cap = _vmem_capacity_bytes()

    # Pipeline byte budget scales with the part: ~24 MiB on 64 MiB VMEM (v7x),
    # ~48 MiB on 128 MiB VMEM (v5e / v6e).  Per-row bytes cover the 3 streamed
    # inputs x 2 pipeline buffers *plus* ~3 f32 compute intermediates
    # (astype copies, (a-x+eps)^2 temporaries) so big tiles never over-commit.
    budget = (vmem_cap * 3) // 8
    per_row_bytes = 3 * 2 * D * itemsize + 3 * D * 4
    max_rows = max(sublane, budget // per_row_bytes)

    if block_rows is None:
        block_rows = max_rows                       # let the byte budget win
    # Budget clamp applies to user-supplied block_rows too.
    block_rows = int(min(block_rows, max_rows, B))
    if B <= sublane:
        block_rows = B                              # full-extent block is legal
    else:
        block_rows = max(sublane, (block_rows // sublane) * sublane)

    num_tiles = (B + block_rows - 1) // block_rows
    needs_mask = (B % block_rows) != 0

    # Scoped-VMEM limit: streamed pipeline + f32 intermediates + headroom,
    # capped at 75% of this generation's physical VMEM.
    pipeline_bytes = 3 * 2 * block_rows * D * itemsize
    compute_bytes = 3 * block_rows * D * 4
    vmem_limit = int(min(max(pipeline_bytes + compute_bytes + (4 << 20), 32 << 20),
                         (vmem_cap * 3) // 4))

    kernel = functools.partial(
        _triplet_loss_kernel, batch=B, block_rows=block_rows,
        needs_mask=needs_mask)

    margin_arr = jnp.asarray([margin], dtype=jnp.float32)

    partial_sums = pl.pallas_call(
        kernel,
        out_shape=jax.ShapeDtypeStruct((num_tiles * 8, 128), jnp.float32),
        grid_spec=pltpu.PrefetchScalarGridSpec(
            num_scalar_prefetch=0,
            grid=(num_tiles,),
            in_specs=[
                pl.BlockSpec(memory_space=pltpu.MemorySpace.SMEM),   # margin
                pl.BlockSpec((block_rows, D), lambda i: (i, 0)),     # anchor
                pl.BlockSpec((block_rows, D), lambda i: (i, 0)),     # pos
                pl.BlockSpec((block_rows, D), lambda i: (i, 0)),     # neg
            ],
            # Full (8,128) output tile per grid step: sublane-aligned,
            # unmasked stores; still one independent tile per grid point.
            out_specs=pl.BlockSpec((8, 128), lambda i: (i, 0)),
        ),
        compiler_params=pltpu.CompilerParams(
            dimension_semantics=("parallel",),
            vmem_limit_bytes=vmem_limit,
        ),
        cost_estimate=pl.CostEstimate(
            flops=8 * B * D,
            transcendentals=2 * B,
            bytes_accessed=3 * B * D * itemsize + num_tiles * 8 * 128 * 4,
        ),
    )(margin_arr, anchor, pos, neg)

    # Finalize: one scalar per tile (same value broadcast over its (8,128)
    # block), summed and divided by the *true* batch size.
    tile_sums = partial_sums.reshape(num_tiles, 8, 128)[:, 0, 0]
    return jnp.sum(tile_sums) / B


if __name__ == "__main__":
    key = jax.random.PRNGKey(0)
    ka, kp, kn = jax.random.split(key, 3)

    # Small (8,128)-aligned feature dim; B chosen so the forced-small-tile run
    # exercises the partial-last-tile masking path (tiles of 16, 16, 8 rows).
    B, D = 40, 128
    anchor = jax.random.normal(ka, (B, D), dtype=jnp.float32)
    pos = jax.random.normal(kp, (B, D), dtype=jnp.float32)
    neg = jax.random.normal(kn, (B, D), dtype=jnp.float32)

    # pure-JAX reference
    dpos = jnp.sqrt(jnp.sum((anchor - pos + _EPS) ** 2, axis=-1))
    dneg = jnp.sqrt(jnp.sum((anchor - neg + _EPS) ** 2, axis=-1))
    ref = jnp.mean(jnp.maximum(dpos - dneg + 1.0, 0.0))

    # 1) auto tile size (byte-budget path, single full tile, no mask emitted)
    loss_auto = triplet_loss(anchor, pos, neg, margin=1.0)
    jax.block_until_ready(loss_auto)
    assert jnp.allclose(loss_auto, ref, atol=1e-5, rtol=1e-5), (loss_auto, ref)

    # 2) forced small tile (user block_rows path + last-tile masking)
    loss_tiled = triplet_loss(anchor, pos, neg, margin=1.0, block_rows=16)
    jax.block_until_ready(loss_tiled)
    assert jnp.allclose(loss_tiled, ref, atol=1e-5, rtol=1e-5), (loss_tiled, ref)

    print("KERNEL_OK")
</pallas_src>

<mosaic_0001>
module attributes {stable_mosaic.version = 11 : i64} {
  func.func @_triplet_loss_kernel(%arg0: i32, %arg1: memref<1xf32, #tpu.memory_space<smem>>, %arg2: memref<40x128xf32, #tpu.memory_space<vmem>>, %arg3: memref<40x128xf32, #tpu.memory_space<vmem>>, %arg4: memref<40x128xf32, #tpu.memory_space<vmem>>, %arg5: memref<8x128xf32, #tpu.memory_space<vmem>>) attributes {dimension_semantics = [#tpu.dimension_semantics<parallel>], iteration_bounds = array<i64: 1>, scalar_prefetch = 0 : i64, scratch_operands = 0 : i64, tpu.core_type = #tpu.core_type<tc>, window_params = [{transform_indices = @transform_0, window_bounds = array<i64: 1>}, {transform_indices = @transform_1, window_bounds = array<i64: 40, 128>}, {transform_indices = @transform_2, window_bounds = array<i64: 40, 128>}, {transform_indices = @transform_3, window_bounds = array<i64: 40, 128>}, {transform_indices = @transform_4, window_bounds = array<i64: 8, 128>}]} {
    %c0 = arith.constant 0 : index
    %c0_0 = arith.constant 0 : index
    %0 = vector.load %arg2[%c0, %c0_0] : memref<40x128xf32, #tpu.memory_space<vmem>>, vector<40x128xf32>
    %c0_1 = arith.constant 0 : index
    %c0_2 = arith.constant 0 : index
    %1 = vector.load %arg3[%c0_1, %c0_2] : memref<40x128xf32, #tpu.memory_space<vmem>>, vector<40x128xf32>
    %c0_3 = arith.constant 0 : index
    %c0_4 = arith.constant 0 : index
    %2 = vector.load %arg4[%c0_3, %c0_4] : memref<40x128xf32, #tpu.memory_space<vmem>>, vector<40x128xf32>
    %3 = arith.subf %0, %1 : vector<40x128xf32>
    %cst = arith.constant 9.99999997E-7 : f32
    %4 = vector.broadcast %cst : f32 to vector<40x128xf32>
    %5 = arith.addf %3, %4 : vector<40x128xf32>
    %6 = arith.mulf %5, %5 : vector<40x128xf32>
    %cst_5 = arith.constant dense<0.000000e+00> : vector<40xf32>
    %7 = vector.multi_reduction <add>, %6, %cst_5 [1] : vector<40x128xf32> to vector<40xf32>
    %8 = vector.shape_cast %7 : vector<40xf32> to vector<40x1xf32>
    %9 = math.sqrt %8 : vector<40x1xf32>
    %10 = arith.subf %0, %2 : vector<40x128xf32>
    %cst_6 = arith.constant 9.99999997E-7 : f32
    %11 = vector.broadcast %cst_6 : f32 to vector<40x128xf32>
    %12 = arith.addf %10, %11 : vector<40x128xf32>
    %13 = arith.mulf %12, %12 : vector<40x128xf32>
    %cst_7 = arith.constant dense<0.000000e+00> : vector<40xf32>
    %14 = vector.multi_reduction <add>, %13, %cst_7 [1] : vector<40x128xf32> to vector<40xf32>
    %15 = vector.shape_cast %14 : vector<40xf32> to vector<40x1xf32>
    %16 = math.sqrt %15 : vector<40x1xf32>
    %c0_8 = arith.constant 0 : index
    %17 = memref.load %arg1[%c0_8] : memref<1xf32, #tpu.memory_space<smem>>
    %18 = arith.subf %9, %16 : vector<40x1xf32>
    %19 = vector.broadcast %17 : f32 to vector<40x1xf32>
    %20 = arith.addf %18, %19 : vector<40x1xf32>
    %cst_9 = arith.constant 0.000000e+00 : f32
    %21 = vector.broadcast %cst_9 : f32 to vector<40x1xf32>
    %22 = arith.maximumf %20, %21 : vector<40x1xf32>
    %23 = vector.shape_cast %22 : vector<40x1xf32> to vector<1x40x1xf32>
    %cst_10 = arith.constant dense<0.000000e+00> : vector<1xf32>
    %24 = vector.multi_reduction <add>, %23, %cst_10 [1, 2] : vector<1x40x1xf32> to vector<1xf32>
    %25 = vector.shape_cast %24 : vector<1xf32> to vector<1x1x1xf32>
    %26 = vector.extract %25[0, 0, 0] : f32 from vector<1x1x1xf32>
    %27 = vector.broadcast %26 : f32 to vector<8x128xf32>
    %c0_11 = arith.constant 0 : index
    %c0_12 = arith.constant 0 : index
    %28 = vector.load %arg5[%c0_11, %c0_12] : memref<8x128xf32, #tpu.memory_space<vmem>>, vector<8x128xf32>
    tpu.vector_store %arg5[%c0_11, %c0_12], %27 {strides = array<i32>} : memref<8x128xf32, #tpu.memory_space<vmem>>, vector<8x128xf32>,
    return
  }
  func.func @transform_0(%arg0: i32) -> i32 {
    %c0_i32 = arith.constant 0 : i32
    %c0_i32_0 = arith.constant 0 : i32
    return %c0_i32 : i32
  }
  func.func @transform_1(%arg0: i32) -> (i32, i32) {
    %c0_i32 = arith.constant 0 : i32
    %c0_i32_0 = arith.constant 0 : i32
    return %arg0, %c0_i32 : i32, i32
  }
  func.func @transform_2(%arg0: i32) -> (i32, i32) {
    %c0_i32 = arith.constant 0 : i32
    %c0_i32_0 = arith.constant 0 : i32
    return %arg0, %c0_i32 : i32, i32
  }
  func.func @transform_3(%arg0: i32) -> (i32, i32) {
    %c0_i32 = arith.constant 0 : i32
    %c0_i32_0 = arith.constant 0 : i32
    return %arg0, %c0_i32 : i32, i32
  }
  func.func @transform_4(%arg0: i32) -> (i32, i32) {
    %c0_i32 = arith.constant 0 : i32
    %c0_i32_0 = arith.constant 0 : i32
    return %arg0, %c0_i32 : i32, i32
  }
}

</mosaic_0001>

<bundles_post_ra>
// kernel: tpu_custom_call.1
= control target key start
LH: loop header
LB: loop body
LE: loop exit
PB: predicated region body
PF: predicated region fallthrough
CT: control target
= control target key end

     0   :  { %10 = vsyncpa [#allocation4], 0  ;;  %s455_s0 = inlined_call_operand.<no memory space> [shape: f32[1], index: 0, kind: input, shape index: {}]   ;;  %s456_s1 = inlined_call_operand.hbm [shape: f32[40,128], index: 1, kind: input, shape index: {}]   ;;  %s457_s2 = inlined_call_operand.hbm [shape: f32[40,128], index: 2, kind: input, shape index: {}]   ;;  %s458_s3 = inlined_call_operand.hbm [shape: f32[40,128], index: 3, kind: input, shape index: {}]   ;;  %s459_s4 = inlined_call_operand.hbm [shape: f32[8,128], index: 4, kind: output, shape index: {}]  }
   0x1   :  { %11 = vsyncpa [#allocation7], 0 }
   0x2   :  { %12 = vsyncpa [#allocation5], 0  ;;  %s363_s15 = smov [#allocation6]   ;;  %s364_s17 = smov [#allocation3]  }
   0x3   :  { %s32_s16 = sshll.u32 %s363_s15, 4  ;;  %s20_s18 = sshll.u32 %s364_s17, 4  ;;  %s33_s16 = int_to_ptr.vmem [resolvable:$true] %s32_s16  ;;  %s21_s18 = int_to_ptr.vmem [resolvable:$true] %s20_s18 }
   0x4   :  { %s285_s19 = scalar_lea.vmem %s33_s16, 640  ;;  %p290_p1 = scmp.lt.s32.totalorder %s33_s16, %s33_s16 }
   0x5   :  { %p286_p0 = scmp.ne.s32.totalorder %s33_s16, %s285_s19  ;;  %p291_p2 = scmp.lt.s32.totalorder %s285_s19, %s285_s19 }
   0x7   :  { %p292_p3 = por %p291_p2, %p290_p1 }
   0x9   :  { %p293_p4 = pnand %p292_p3, %p286_p0 }
   0xb   :  { %296 = shalt.err (!%p293_p4)
}
   0xc   :  { %s365_s20 = smov 128   ;;  %s366_s21 = smov 8  }
   0xd   :  { %38 = dma.hbm_to_vmem [thread:$0]  %s457_s2, 640, %s33_s16, [#allocation7], %s365_s20, %s365_s20, %s366_s21  }
   0xe   :  { %s305_s24 = scalar_lea.vmem %s21_s18, 640  ;;  %p310_p6 = scmp.lt.s32.totalorder %s21_s18, %s21_s18 }
   0xf   :  { %p306_p5 = scmp.ne.s32.totalorder %s21_s18, %s305_s24  ;;  %p311_p7 = scmp.lt.s32.totalorder %s305_s24, %s305_s24 }
  0x11   :  { %p312_p8 = por %p311_p7, %p310_p6 }
  0x13   :  { %p313_p9 = pnand %p312_p8, %p306_p5 }
  0x15   :  { %316 = shalt.err (!%p313_p9)
}
  0x16   :  { %26 = dma.hbm_to_vmem [thread:$0]  %s456_s1, 640, %s21_s18, [#allocation4], %s365_s20, %s365_s20, %s366_s21  }
  0x17   :  { %s367_s27 = smov [#allocation8]  }
  0x18   :  { %s44_s28 = sshll.u32 %s367_s27, 4  ;;  %s45_s28 = int_to_ptr.vmem [resolvable:$true] %s44_s28 }
  0x19   :  { %s325_s29 = scalar_lea.vmem %s45_s28, 640  ;;  %p330_p11 = scmp.lt.s32.totalorder %s45_s28, %s45_s28 }
  0x1a   :  { %p326_p10 = scmp.ne.s32.totalorder %s45_s28, %s325_s29  ;;  %p331_p12 = scmp.lt.s32.totalorder %s325_s29, %s325_s29 }
  0x1c   :  { %p332_p13 = por %p331_p12, %p330_p11 }
  0x1e   :  { %p333_p0 = pnand %p332_p13, %p326_p10 }
  0x20   :  { %336 = shalt.err (!%p333_p0)
}
  0x21   :  { %50 = dma.hbm_to_vmem [thread:$0]  %s458_s3, 640, %s45_s28, [#allocation7], %s365_s20, %s365_s20, %s366_s21  }
  0x22   :  { %357 = dma.done.wait [#allocation4], 640  }
  0x23   :  { %358 = vsyncadd [#allocation4], 4294966656 }
  0x24   :  { %359 = dma.done.wait [#allocation7], 1280  }
  0x25   :  { %360 = vsyncadd [#allocation7], 4294966016  ;;  %v60_v0 = vld [vmem:[#allocation3] sm:$0xff]  ;;  %v70_v1 = vld [vmem:[#allocation8] sm:$0xff]  ;;  %vm212_vm12 = vcmask 7168  }
  0x26   :  { %v65_v2 = vld [vmem:[#allocation6] sm:$0xff]  ;;  %v135_v3 = vsub.f32 %v60_v0, %v70_v1  ;;  %v71_v6 = vld [vmem:[#allocation8 + $0x8] sm:$0xff]  ;;  %v66_v7 = vld [vmem:[#allocation6 + $0x8] sm:$0xff] }
  0x27   :  { %v75_v4 = vsub.f32 %v60_v0, %v65_v2  ;;  %v61_v5 = vld [vmem:[#allocation3 + $0x8] sm:$0xff]  ;;  %v62_v10 = vld [vmem:[#allocation3 + $0x10] sm:$0xff]  ;;  %v72_v11 = vld [vmem:[#allocation8 + $0x10] sm:$0xff] }
  0x28   :  { %v136_v8 = vsub.f32 %v61_v5, %v71_v6  ;;  %v76_v9 = vsub.f32 %v61_v5, %v66_v7  ;;  %v67_v12 = vld [vmem:[#allocation6 + $0x10] sm:$0xff]  ;;  %v140_v13 = vadd.f32 1e-06, %v135_v3  ;;  %v137_v15 = vsub.f32 %v62_v10, %v72_v11  ;;  %v73_v18 = vld [vmem:[#allocation8 + $0x18] sm:$0xff]  ;;  %v68_v21 = vld [vmem:[#allocation6 + $0x18] sm:$0xff] }
  0x29   :  { %v80_v14 = vadd.f32 1e-06, %v75_v4  ;;  %v77_v16 = vsub.f32 %v62_v10, %v67_v12  ;;  %v63_v17 = vld [vmem:[#allocation3 + $0x18] sm:$0xff]  ;;  %v64_v30 = vld [vmem:[#allocation3 + $0x20] sm:$0xff]  ;;  %v74_v31 = vld [vmem:[#allocation8 + $0x20] sm:$0xff]  ;;  %v201_v11 = vstv %s455_s0  ;;  %s368_s0 = smov [#allocation9]  }
  0x2a   :  { %v141_v19 = vadd.f32 1e-06, %v136_v8  ;;  %v81_v20 = vadd.f32 1e-06, %v76_v9  ;;  %v145_v22 = vmul.f32 %v140_v13, %v140_v13  ;;  %v142_v24 = vadd.f32 1e-06, %v137_v15 }
  0x2b   :  { %v85_v23 = vmul.f32 %v80_v14, %v80_v14  ;;  %v138_v25 = vsub.f32 %v63_v17, %v73_v18  ;;  %v82_v28 = vadd.f32 1e-06, %v77_v16  ;;  %v78_v29 = vsub.f32 %v63_v17, %v68_v21  ;;  %v69_v32 = vld [vmem:[#allocation6 + $0x20] sm:$0xff]  ;;  %s239_s5 = sshll.u32 %s368_s0, 4  ;;  %s240_s5 = int_to_ptr.vmem [resolvable:$true] %s239_s5 }
  0x2c   :  { %150 = vadd.xlane.f32.xlu1 %v145_v22  ;;  %v146_v26 = vmul.f32 %v141_v19, %v141_v19  ;;  %v86_v27 = vmul.f32 %v81_v20, %v81_v20  ;;  %v147_v33 = vmul.f32 %v142_v24, %v142_v24  ;;  %v139_v37 = vsub.f32 %v64_v30, %v74_v31  ;;  %s337_s7 = scalar_lea.vmem %s240_s5, 128  ;;  %p342_p2 = scmp.lt.s32.totalorder %s240_s5, %s240_s5 }
  0x2d   :  { %90 = vadd.xlane.f32.xlu0 %v85_v23  ;;  %v143_v34 = vadd.f32 1e-06, %v138_v25  ;;  %v87_v35 = vmul.f32 %v82_v28, %v82_v28  ;;  %v83_v36 = vadd.f32 1e-06, %v78_v29  ;;  %v79_v38 = vsub.f32 %v64_v30, %v69_v32  ;;  %p338_p1 = scmp.ne.s32.totalorder %s240_s5, %s337_s7  ;;  %p343_p3 = scmp.lt.s32.totalorder %s337_s7, %s337_s7 }
  0x2e   :  { %v144_v41 = vadd.f32 1e-06, %v139_v37 }
  0x2f   :  { %v148_v39 = vmul.f32 %v143_v34, %v143_v34  ;;  %v88_v40 = vmul.f32 %v83_v36, %v83_v36  ;;  %v84_v42 = vadd.f32 1e-06, %v79_v38  ;;  %p344_p4 = por %p343_p3, %p342_p2 }
  0x30   :  { %152 = vadd.xlane.f32.xlu1 %v146_v26  ;;  %v149_v43 = vmul.f32 %v144_v41, %v144_v41 }
  0x31   :  { %92 = vadd.xlane.f32.xlu0 %v86_v27  ;;  %v89_v44 = vmul.f32 %v84_v42, %v84_v42  ;;  %p345_p5 = pnand %p344_p4, %p338_p1 }
  0x34   :  { %154 = vadd.xlane.f32.xlu1 %v147_v33 }
  0x35   :  { %94 = vadd.xlane.f32.xlu0 %v87_v35 }
  0x38   :  { %156 = vadd.xlane.f32.xlu1 %v148_v39 }
  0x39   :  { %96 = vadd.xlane.f32.xlu0 %v88_v40 }
  0x3c   :  { %158 = vadd.xlane.f32.xlu1 %v149_v43 }
  0x3d   :  { %98 = vadd.xlane.f32.xlu0 %v89_v44 }
  0xb5   :  { %v151_v45 = vpop.xlane.xlu1 %150 }
  0xb6   :  { %v91_v46 = vpop.xlane.xlu0 %90  ;;  %257 = vrsqrt.f32 %v151_v45  ;;  %vm162_vm0 = vcmp.eq.f32.partialorder %v151_v45, inf  ;;  %vm164_vm1 = vcmp.eq.f32.partialorder %v151_v45, 0.0  ;;  %v165_v61 = vand.u32 2147483648, %v151_v45 }
  0xb7   :  { %259 = vrsqrt.f32 %v91_v46  ;;  %vm102_vm2 = vcmp.eq.f32.partialorder %v91_v46, inf  ;;  %vm104_vm3 = vcmp.eq.f32.partialorder %v91_v46, 0.0  ;;  %v105_v0 = vand.u32 2147483648, %v91_v46 }
  0xb9   :  { %v153_v47 = vpop.xlane.xlu1 %152 }
  0xba   :  { %v93_v48 = vpop.xlane.xlu0 %92  ;;  %261 = vrsqrt.f32 %v153_v47  ;;  %vm169_vm4 = vcmp.eq.f32.partialorder %v153_v47, inf  ;;  %vm171_vm5 = vcmp.eq.f32.partialorder %v153_v47, 0.0  ;;  %v172_v2 = vand.u32 2147483648, %v153_v47 }
  0xbb   :  { %263 = vrsqrt.f32 %v93_v48  ;;  %vm109_vm6 = vcmp.eq.f32.partialorder %v93_v48, inf  ;;  %v112_v5 = vand.u32 2147483648, %v93_v48  ;;  %vm111_vm7 = vcmp.eq.f32.partialorder %v93_v48, 0.0 }
  0xbd   :  { %v155_v49 = vpop.xlane.xlu1 %154 }
  0xbe   :  { %v403_v50 = vpop.xlane.xlu0 %94  ;;  %265 = vrsqrt.f32 %v155_v49  ;;  %vm176_vm8 = vcmp.eq.f32.partialorder %v155_v49, inf  ;;  %vm178_vm9 = vcmp.eq.f32.partialorder %v155_v49, 0.0  ;;  %v179_v15 = vand.u32 2147483648, %v155_v49 }
  0xbf   :  { %267 = vrsqrt.f32 %v403_v50  ;;  %vm116_vm10 = vcmp.eq.f32.partialorder %v403_v50, inf  ;;  %vm118_vm11 = vcmp.eq.f32.partialorder %v403_v50, 0.0  ;;  %v119_v20 = vand.u32 2147483648, %v403_v50 }
  0xc1   :  { %v406_v51 = vpop.xlane.xlu1 %156 }
  0xc2   :  { %v408_v52 = vpop.xlane.xlu0 %96  ;;  %269 = vrsqrt.f32 %v406_v51  ;;  %vm183_vm13 = vcmp.eq.f32.partialorder %v406_v51, inf  ;;  %vm185_vm14 = vcmp.eq.f32.partialorder %v406_v51, 0.0  ;;  %v186_v27 = vand.u32 2147483648, %v406_v51 }
  0xc3   :  { %v258_v53 = vpop.eup %257  ;;  %271 = vrsqrt.f32 %v408_v52  ;;  %vm123_vm15 = vcmp.eq.f32.partialorder %v408_v52, inf  ;;  %v126_v33 = vand.u32 2147483648, %v408_v52 }
  0xc4   :  { %v260_v54 = vpop.eup %259  ;;  %v161_v55 = vmul.f32 %v258_v53, %v151_v45 }
  0xc5   :  { %v101_v56 = vmul.f32 %v260_v54, %v91_v46  ;;  %v412_v57 = vpop.xlane.xlu1 %158 }
  0xc6   :  { %v414_v58 = vpop.xlane.xlu0 %98  ;;  %273 = vrsqrt.f32 %v412_v57  ;;  %v163_v60 = vsel %vm162_vm0, %v151_v45, %v161_v55  ;;  %vm125_vm0 = vcmp.eq.f32.partialorder %v408_v52, 0.0  ;;  %v193_v41 = vand.u32 2147483648, %v412_v57 }
  0xc7   :  { %v262_v59 = vpop.eup %261  ;;  %v103_v62 = vsel %vm102_vm2, %v91_v46, %v101_v56  ;;  %275 = vrsqrt.f32 %v414_v58  ;;  %v166_v7 = vsel %vm164_vm1, %v165_v61, %v163_v60  ;;  %vm190_vm1 = vcmp.eq.f32.partialorder %v412_v57, inf }
  0xc8   :  { %v264_v63 = vpop.eup %263  ;;  %v168_v1 = vmul.f32 %v262_v59, %v153_v47  ;;  %v106_v6 = vsel %vm104_vm3, %v105_v0, %v103_v62  ;;  %vm192_vm2 = vcmp.eq.f32.partialorder %v412_v57, 0.0  ;;  %vm130_vm3 = vcmp.eq.f32.partialorder %v414_v58, inf }
  0xc9   :  { %v108_v3 = vmul.f32 %v264_v63, %v93_v48  ;;  %v196_v17 = vsub.f32 %v106_v6, %v166_v7 }
  0xca   :  { %v170_v4 = vsel %vm169_vm4, %v153_v47, %v168_v1  ;;  %vm132_vm4 = vcmp.eq.f32.partialorder %v414_v58, 0.0 }
  0xcb   :  { %v266_v8 = vpop.eup %265  ;;  %v110_v9 = vsel %vm109_vm6, %v93_v48, %v108_v3  ;;  %v173_v10 = vsel %vm171_vm5, %v172_v2, %v170_v4  ;;  %v202_v31 = vadd.f32 %v201_v11, %v196_v17  ;;  %v133_v48 = vand.u32 2147483648, %v414_v58 }
  0xcc   :  { %v268_v12 = vpop.eup %267  ;;  %v175_v13 = vmul.f32 %v266_v8, %v155_v49  ;;  %v113_v14 = vsel %vm111_vm7, %v112_v5, %v110_v9 }
  0xcd   :  { %v115_v16 = vmul.f32 %v268_v12, %v403_v50  ;;  %v197_v18 = vsub.f32 %v113_v14, %v173_v10  ;;  %v207_v45 = vmax.f32 %v202_v31, 0.0 }
  0xce   :  { %v177_v19 = vsel %vm176_vm8, %v155_v49, %v175_v13 }
  0xcf   :  { %v270_v21 = vpop.eup %269  ;;  %v117_v22 = vsel %vm116_vm10, %v403_v50, %v115_v16  ;;  %v180_v23 = vsel %vm178_vm9, %v179_v15, %v177_v19  ;;  %v203_v24 = vadd.f32 %v201_v11, %v197_v18  ;;  %v213_v56 = vsel %vm212_vm12, %v207_v45, 0.0 }
  0xd0   :  { %v272_v25 = vpop.eup %271  ;;  %v182_v26 = vmul.f32 %v270_v21, %v406_v51  ;;  %v120_v28 = vsel %vm118_vm11, %v119_v20, %v117_v22 }
  0xd1   :  { %v122_v29 = vmul.f32 %v272_v25, %v408_v52  ;;  %v198_v30 = vsub.f32 %v120_v28, %v180_v23  ;;  %v208_v38 = vmax.f32 %v203_v24, 0.0 }
  0xd2   :  { %v184_v32 = vsel %vm183_vm13, %v406_v51, %v182_v26 }
  0xd3   :  { %v274_v34 = vpop.eup %273  ;;  %v124_v35 = vsel %vm123_vm15, %v408_v52, %v122_v29  ;;  %v187_v36 = vsel %vm185_vm14, %v186_v27, %v184_v32  ;;  %v204_v37 = vadd.f32 %v201_v11, %v198_v30  ;;  %v214_v52 = vsel %vm212_vm12, %v208_v38, 0.0 }
  0xd4   :  { %v276_v39 = vpop.eup %275  ;;  %v189_v40 = vmul.f32 %v274_v34, %v412_v57  ;;  %v127_v42 = vsel %vm125_vm0, %v126_v33, %v124_v35 }
  0xd5   :  { %v129_v43 = vmul.f32 %v276_v39, %v414_v58  ;;  %v199_v44 = vsub.f32 %v127_v42, %v187_v36  ;;  %v209_v46 = vmax.f32 %v204_v37, 0.0 }
  0xd6   :  { %v191_v47 = vsel %vm190_vm1, %v412_v57, %v189_v40  ;;  %v215_v57 = vadd.f32 %v214_v52, %v213_v56 }
  0xd7   :  { %v131_v49 = vsel %vm130_vm3, %v414_v58, %v129_v43  ;;  %v194_v50 = vsel %vm192_vm2, %v193_v41, %v191_v47  ;;  %v205_v51 = vadd.f32 %v201_v11, %v199_v44  ;;  %v216_v59 = vsel %vm212_vm12, %v209_v46, 0.0 }
  0xd8   :  { %v134_v53 = vsel %vm132_vm4, %v133_v48, %v131_v49  ;;  %v217_v62 = vadd.f32 %v216_v59, %v215_v57 }
  0xd9   :  { %v200_v54 = vsub.f32 %v134_v53, %v194_v50  ;;  %v210_v55 = vmax.f32 %v205_v51, 0.0 }
  0xdb   :  { %v206_v60 = vadd.f32 %v201_v11, %v200_v54  ;;  %v218_v61 = vsel %vm212_vm12, %v210_v55, 0.0 }
  0xdc   :  { %v219_v0 = vadd.f32 %v218_v61, %v217_v62 }
  0xdd   :  { %v211_v63 = vmax.f32 %v206_v60, 0.0 }
  0xdf   :  { %v220_v58 = vsel %vm212_vm12, %v211_v63, 0.0 }
  0xe0   :  { %v221_v1 = vadd.f32 %v220_v58, %v219_v0 }
  0xe2   :  { %222 = vadd.xlane.f32.xlu0 %v221_v1 }
 0x16b   :  { %v223_v2 = vpop.xlane.xlu0 %222 }
 0x16c   :  { %v224_v3 = vrot.slane %v223_v2, 4 }
 0x16e   :  { %v225_v4 = vadd.f32 %v224_v3, %v223_v2 }
 0x170   :  { %v226_v5 = vrot.slane %v225_v4, 2 }
 0x172   :  { %v227_v6 = vadd.f32 %v226_v5, %v225_v4 }
 0x174   :  { %v228_v7 = vrot.slane %v227_v6, 1 }
 0x176   :  { %v229_v8 = vadd.f32 %v228_v7, %v227_v6 }
 0x178   :  { %249 = vpush %v229_v8 }
 0x1a9   :  { %s250_s6 = spop %249 }
 0x1aa   :  { %v231_v9 = vstv %s250_s6 }
 0x1ab   :  { %232 = vst [vmem:[#allocation9] sm:$0xff] %v231_v9 }
 0x1ac   :  { %348 = shalt.err (!%p345_p5)
}
 0x1ad   :  { %242 = dma.vmem_to_hbm [thread:$0]  %s240_s5, 128, %s459_s4, [#allocation5]  }
 0x1ae   :  { %361 = dma.done.wait [#allocation5], 128  }
 0x1af   :  { %362 = vsyncadd [#allocation5], 4294967168 }
 0x1b0   :  { %246 = vsyncpa [#allocation4], 1 }
 0x1b1   :  { %247 = vsyncpa [#allocation7], 1 }
 0x1b2   :  { %248 = vsyncpa [#allocation5], 1 }

</bundles_post_ra>
